<compile_context>
chip_gen: v5e
topology: v5e:2x2
jax: 0.10.0
libtpu: 0.0.40
codegen_flags: <defaults>
</compile_context>

<pallas_src>
import jax
import jax.numpy as jnp
from jax.experimental import pallas as pl
from jax.experimental.pallas import tpu as pltpu

D_IN, D_H1, D_H2, D_OUT = 128, 128, 256, 4
D_OUT_PAD = 128  # lane-dense padded output width


def _round_up(n, m):
    return (n + m - 1) // m * m


def _choose_tb(B):
    """Batch tile: big tiles for DMA efficiency, >=2 grid steps for v7x megacore."""
    if B < 256:
        return _round_up(max(B, 1), 16)   # bf16 sublane packing is 16
    tb = 1024
    while tb > 256 and _round_up(B, tb) // tb < 2:
        tb //= 2                          # 1024 -> 512 -> 256, all multiples of 256
    return tb


def dqn_kernel(x_ref, w1_ref, b1_ref, w2_ref, b2_ref, w3_ref, b3_ref, o_ref):
    # dense1 + relu: bf16 MXU operands, f32 accumulate, f32 elementwise
    h1 = jnp.dot(x_ref[...], w1_ref[...], preferred_element_type=jnp.float32)
    h1 = jnp.maximum(h1 + b1_ref[...], 0.0)
    # dense2 + relu
    h2 = jnp.dot(h1.astype(jnp.bfloat16), w2_ref[...],
                 preferred_element_type=jnp.float32)
    h2 = jnp.maximum(h2 + b2_ref[...], 0.0)
    # outputs (no activation); lane-dense 128-wide bf16 store, first 4 cols real
    out = jnp.dot(h2.astype(jnp.bfloat16), w3_ref[...],
                  preferred_element_type=jnp.float32)
    o_ref[...] = (out + b3_ref[...]).astype(o_ref.dtype)


def dqn_forward(x, params, *, tb=None):
    """x: (B, 128) float32. params: dict from init_params. Returns (B, 4) f32."""
    B = x.shape[0]
    if tb is None:
        tb = _choose_tb(B)
    Bp = _round_up(B, tb)
    if Bp != B:
        x = jnp.pad(x, ((0, Bp - B), (0, 0)))
    # Wrapper-side bf16 cast: halves input HBM traffic; bit-identical to casting
    # inside the kernel right before the bf16 dot.
    x = x.astype(jnp.bfloat16)

    w1, b1, w2, b2, w3, b3 = (params["w1"], params["b1"], params["w2"],
                              params["b2"], params["w3"], params["b3"])

    def weight_spec(a):
        return pl.BlockSpec(a.shape, lambda i: (0, 0))  # VMEM-resident weights

    flops = 2 * Bp * (D_IN * D_H1 + D_H1 * D_H2 + D_H2 * D_OUT_PAD)
    bytes_accessed = (
        x.size * x.dtype.itemsize                                   # bf16 input
        + sum(a.size * a.dtype.itemsize for a in (w1, b1, w2, b2, w3, b3))
        + Bp * D_OUT_PAD * 2)                                       # bf16 output

    out = pl.pallas_call(
        dqn_kernel,
        out_shape=jax.ShapeDtypeStruct((Bp, D_OUT_PAD), jnp.bfloat16),
        grid=(Bp // tb,),
        in_specs=[
            pl.BlockSpec((tb, D_IN), lambda i: (i, 0)),   # x: tiled over batch
            weight_spec(w1), weight_spec(b1),
            weight_spec(w2), weight_spec(b2),
            weight_spec(w3), weight_spec(b3),
        ],
        out_specs=pl.BlockSpec((tb, D_OUT_PAD), lambda i: (i, 0)),
        compiler_params=pltpu.CompilerParams(
            dimension_semantics=("parallel",)),
        cost_estimate=pl.CostEstimate(
            flops=flops, transcendentals=0, bytes_accessed=bytes_accessed),
    )(x, w1, b1, w2, b2, w3, b3)
    # Small post-kernel slice+cast; fuses into the consumer under jit.
    return out[:B, :D_OUT].astype(jnp.float32)


def init_params(key):
    """Deterministic init mirroring nn.Linear; weights stored (in, out) bf16."""
    ks = jax.random.split(key, 6)

    def linear(kw, kb, fan_in, fan_out):
        bound = 1.0 / float(fan_in) ** 0.5
        # PyTorch stores weight as (out, in); generate that then transpose.
        w = jax.random.uniform(kw, (fan_out, fan_in), jnp.float32, -bound, bound)
        b = jax.random.uniform(kb, (fan_out,), jnp.float32, -bound, bound)
        return w.T, b.reshape(1, fan_out)

    w1, b1 = linear(ks[0], ks[1], D_IN, D_H1)
    w2, b2 = linear(ks[2], ks[3], D_H1, D_H2)
    w3, b3 = linear(ks[4], ks[5], D_H2, D_OUT)
    # Lane-dense output: zero-pad the 4 action columns out to 128.
    w3 = jnp.pad(w3, ((0, 0), (0, D_OUT_PAD - D_OUT)))
    b3 = jnp.pad(b3, ((0, 0), (0, D_OUT_PAD - D_OUT)))
    # MXU operands as bf16 (f32 accumulation in-kernel); biases stay f32.
    return dict(w1=w1.astype(jnp.bfloat16), b1=b1,
                w2=w2.astype(jnp.bfloat16), b2=b2,
                w3=w3.astype(jnp.bfloat16), b3=b3)


def dqn_ref(x, p):
    """Pure-JAX reference mirroring the kernel's numerics (bf16 ops, f32 acc,
    bf16 output rounding)."""
    h1 = jnp.maximum(
        jnp.dot(x.astype(jnp.bfloat16), p["w1"],
                preferred_element_type=jnp.float32) + p["b1"], 0.0)
    h2 = jnp.maximum(
        jnp.dot(h1.astype(jnp.bfloat16), p["w2"],
                preferred_element_type=jnp.float32) + p["b2"], 0.0)
    out = jnp.dot(h2.astype(jnp.bfloat16), p["w3"],
                  preferred_element_type=jnp.float32) + p["b3"]
    out = out.astype(jnp.bfloat16).astype(jnp.float32)  # kernel stores bf16
    return out[:, :D_OUT]


if __name__ == "__main__":
    key = jax.random.PRNGKey(0)
    kx, kp = jax.random.split(key)
    B = 8  # small deterministic example; kernel tiles any batch size
    x = jax.random.normal(kx, (B, D_IN), jnp.float32)
    params = init_params(kp)

    out = jax.block_until_ready(dqn_forward(x, params))
    ref = dqn_ref(x, params)

    assert out.shape == (B, D_OUT), out.shape
    assert out.dtype == jnp.float32, out.dtype
    assert jnp.allclose(out, ref, atol=1e-2, rtol=1e-2), (
        float(jnp.max(jnp.abs(out - ref))))
    print("KERNEL_OK")
</pallas_src>

<mosaic_0001>
module attributes {stable_mosaic.version = 11 : i64} {
  func.func @dqn_kernel(%arg0: i32, %arg1: memref<16x128xbf16, #tpu.memory_space<vmem>>, %arg2: memref<128x128xbf16, #tpu.memory_space<vmem>>, %arg3: memref<1x128xf32, #tpu.memory_space<vmem>>, %arg4: memref<128x256xbf16, #tpu.memory_space<vmem>>, %arg5: memref<1x256xf32, #tpu.memory_space<vmem>>, %arg6: memref<256x128xbf16, #tpu.memory_space<vmem>>, %arg7: memref<1x128xf32, #tpu.memory_space<vmem>>, %arg8: memref<16x128xbf16, #tpu.memory_space<vmem>>) attributes {dimension_semantics = [#tpu.dimension_semantics<parallel>], iteration_bounds = array<i64: 1>, scalar_prefetch = 0 : i64, scratch_operands = 0 : i64, tpu.core_type = #tpu.core_type<tc>, window_params = [{transform_indices = @transform_0, window_bounds = array<i64: 16, 128>}, {pipeline_mode = #tpu.pipeline_mode<synchronous>, transform_indices = @transform_1, window_bounds = array<i64: 128, 128>}, {pipeline_mode = #tpu.pipeline_mode<synchronous>, transform_indices = @transform_2, window_bounds = array<i64: 1, 128>}, {pipeline_mode = #tpu.pipeline_mode<synchronous>, transform_indices = @transform_3, window_bounds = array<i64: 128, 256>}, {pipeline_mode = #tpu.pipeline_mode<synchronous>, transform_indices = @transform_4, window_bounds = array<i64: 1, 256>}, {pipeline_mode = #tpu.pipeline_mode<synchronous>, transform_indices = @transform_5, window_bounds = array<i64: 256, 128>}, {pipeline_mode = #tpu.pipeline_mode<synchronous>, transform_indices = @transform_6, window_bounds = array<i64: 1, 128>}, {transform_indices = @transform_7, window_bounds = array<i64: 16, 128>}]} {
    %c0 = arith.constant 0 : index
    %c0_0 = arith.constant 0 : index
    %0 = vector.load %arg1[%c0, %c0_0] : memref<16x128xbf16, #tpu.memory_space<vmem>>, vector<16x128xbf16>
    %c0_1 = arith.constant 0 : index
    %c0_2 = arith.constant 0 : index
    %1 = vector.load %arg2[%c0_1, %c0_2] : memref<128x128xbf16, #tpu.memory_space<vmem>>, vector<128x128xbf16>
    %cst = arith.constant dense<0.000000e+00> : vector<16x128xf32>
    %2 = tpu.matmul %0, %1, %cst {dimension_numbers = #tpu.dot_dimension_numbers<[1], [0], [0], [1], [0, 0, 1, 1], [], []>} : vector<16x128xbf16>, vector<128x128xbf16>, vector<16x128xf32> -> vector<16x128xf32>
    %c0_3 = arith.constant 0 : index
    %c0_4 = arith.constant 0 : index
    %3 = vector.load %arg3[%c0_3, %c0_4] : memref<1x128xf32, #tpu.memory_space<vmem>>, vector<1x128xf32>
    %4 = vector.broadcast %3 : vector<1x128xf32> to vector<16x128xf32>
    %5 = arith.addf %2, %4 : vector<16x128xf32>
    %cst_5 = arith.constant 0.000000e+00 : f32
    %6 = vector.broadcast %cst_5 : f32 to vector<16x128xf32>
    %7 = arith.maximumf %5, %6 : vector<16x128xf32>
    %8 = arith.truncf %7 : vector<16x128xf32> to vector<16x128xbf16>
    %c0_6 = arith.constant 0 : index
    %c0_7 = arith.constant 0 : index
    %9 = vector.load %arg4[%c0_6, %c0_7] : memref<128x256xbf16, #tpu.memory_space<vmem>>, vector<128x256xbf16>
    %cst_8 = arith.constant dense<0.000000e+00> : vector<16x256xf32>
    %10 = tpu.matmul %8, %9, %cst_8 {dimension_numbers = #tpu.dot_dimension_numbers<[1], [0], [0], [1], [0, 0, 1, 1], [], []>} : vector<16x128xbf16>, vector<128x256xbf16>, vector<16x256xf32> -> vector<16x256xf32>
    %c0_9 = arith.constant 0 : index
    %c0_10 = arith.constant 0 : index
    %11 = vector.load %arg5[%c0_9, %c0_10] : memref<1x256xf32, #tpu.memory_space<vmem>>, vector<1x256xf32>
    %12 = vector.broadcast %11 : vector<1x256xf32> to vector<16x256xf32>
    %13 = arith.addf %10, %12 : vector<16x256xf32>
    %cst_11 = arith.constant 0.000000e+00 : f32
    %14 = vector.broadcast %cst_11 : f32 to vector<16x256xf32>
    %15 = arith.maximumf %13, %14 : vector<16x256xf32>
    %16 = arith.truncf %15 : vector<16x256xf32> to vector<16x256xbf16>
    %c0_12 = arith.constant 0 : index
    %c0_13 = arith.constant 0 : index
    %17 = vector.load %arg6[%c0_12, %c0_13] : memref<256x128xbf16, #tpu.memory_space<vmem>>, vector<256x128xbf16>
    %cst_14 = arith.constant dense<0.000000e+00> : vector<16x128xf32>
    %18 = tpu.matmul %16, %17, %cst_14 {dimension_numbers = #tpu.dot_dimension_numbers<[1], [0], [0], [1], [0, 0, 1, 1], [], []>} : vector<16x256xbf16>, vector<256x128xbf16>, vector<16x128xf32> -> vector<16x128xf32>
    %c0_15 = arith.constant 0 : index
    %c0_16 = arith.constant 0 : index
    %19 = vector.load %arg7[%c0_15, %c0_16] : memref<1x128xf32, #tpu.memory_space<vmem>>, vector<1x128xf32>
    %20 = vector.broadcast %19 : vector<1x128xf32> to vector<16x128xf32>
    %21 = arith.addf %18, %20 : vector<16x128xf32>
    %22 = arith.truncf %21 : vector<16x128xf32> to vector<16x128xbf16>
    %c0_17 = arith.constant 0 : index
    %c0_18 = arith.constant 0 : index
    %23 = vector.load %arg8[%c0_17, %c0_18] : memref<16x128xbf16, #tpu.memory_space<vmem>>, vector<16x128xbf16>
    tpu.vector_store %arg8[%c0_17, %c0_18], %22 {strides = array<i32>} : memref<16x128xbf16, #tpu.memory_space<vmem>>, vector<16x128xbf16>,
    return
  }
  func.func @transform_0(%arg0: i32) -> (i32, i32) {
    %c0_i32 = arith.constant 0 : i32
    %c0_i32_0 = arith.constant 0 : i32
    return %arg0, %c0_i32 : i32, i32
  }
  func.func @transform_1(%arg0: i32) -> (i32, i32) {
    %c0_i32 = arith.constant 0 : i32
    %c0_i32_0 = arith.constant 0 : i32
    %c0_i32_1 = arith.constant 0 : i32
    return %c0_i32, %c0_i32_0 : i32, i32
  }
  func.func @transform_2(%arg0: i32) -> (i32, i32) {
    %c0_i32 = arith.constant 0 : i32
    %c0_i32_0 = arith.constant 0 : i32
    %c0_i32_1 = arith.constant 0 : i32
    return %c0_i32, %c0_i32_0 : i32, i32
  }
  func.func @transform_3(%arg0: i32) -> (i32, i32) {
    %c0_i32 = arith.constant 0 : i32
    %c0_i32_0 = arith.constant 0 : i32
    %c0_i32_1 = arith.constant 0 : i32
    return %c0_i32, %c0_i32_0 : i32, i32
  }
  func.func @transform_4(%arg0: i32) -> (i32, i32) {
    %c0_i32 = arith.constant 0 : i32
    %c0_i32_0 = arith.constant 0 : i32
    %c0_i32_1 = arith.constant 0 : i32
    return %c0_i32, %c0_i32_0 : i32, i32
  }
  func.func @transform_5(%arg0: i32) -> (i32, i32) {
    %c0_i32 = arith.constant 0 : i32
    %c0_i32_0 = arith.constant 0 : i32
    %c0_i32_1 = arith.constant 0 : i32
    return %c0_i32, %c0_i32_0 : i32, i32
  }
  func.func @transform_6(%arg0: i32) -> (i32, i32) {
    %c0_i32 = arith.constant 0 : i32
    %c0_i32_0 = arith.constant 0 : i32
    %c0_i32_1 = arith.constant 0 : i32
    return %c0_i32, %c0_i32_0 : i32, i32
  }
  func.func @transform_7(%arg0: i32) -> (i32, i32) {
    %c0_i32 = arith.constant 0 : i32
    %c0_i32_0 = arith.constant 0 : i32
    return %arg0, %c0_i32 : i32, i32
  }
}

</mosaic_0001>

<bundles_post_ra>
// kernel: tpu_custom_call.1
= control target key start
LH: loop header
LB: loop body
LE: loop exit
PB: predicated region body
PF: predicated region fallthrough
CT: control target
= control target key end

     0   :  { %12 = vsyncpa [#allocation3], 0  ;;  %s938_s0 = inlined_call_operand.hbm [shape: bf16[16,128], index: 0, kind: input, shape index: {}]   ;;  %s939_s1 = inlined_call_operand.hbm [shape: bf16[128,128], index: 1, kind: input, shape index: {}]   ;;  %s940_s2 = inlined_call_operand.vmem [shape: f32[1,128], index: 2, kind: input, shape index: {}]   ;;  %s941_s3 = inlined_call_operand.hbm [shape: bf16[128,256], index: 3, kind: input, shape index: {}]   ;;  %s942_s4 = inlined_call_operand.vmem [shape: f32[1,256], index: 4, kind: input, shape index: {}]   ;;  %s943_s5 = inlined_call_operand.hbm [shape: bf16[256,128], index: 5, kind: input, shape index: {}]   ;;  %s944_s6 = inlined_call_operand.vmem [shape: f32[1,128], index: 6, kind: input, shape index: {}]   ;;  %s945_s7 = inlined_call_operand.hbm [shape: bf16[16,128], index: 7, kind: output, shape index: {}]  }
   0x1   :  { %13 = vsyncpa [#allocation6], 0 }
   0x2   :  { %14 = vsyncpa [#allocation9], 0 }
   0x3   :  { %15 = vsyncpa [#allocation4], 0  ;;  %s33_s26 = sshll.u32 %s939_s1, 4  ;;  %s853_s27 = smov [#allocation5]   ;;  %s34_s26 = int_to_ptr.hbm [resolvable:$true] %s33_s26 }
   0x4   :  { %s35_s28 = sshll.u32 %s853_s27, 4  ;;  %s20_s8 = sshll.u32 %s938_s0, 4  ;;  %s36_s28 = int_to_ptr.vmem [resolvable:$true] %s35_s28  ;;  %s21_s8 = int_to_ptr.hbm [resolvable:$true] %s20_s8 }
   0x5   :  { %s854_s9 = smov 64   ;;  %s855_s10 = smov 4  }
   0x6   :  { %41 = dma.hbm_to_vmem [thread:$0]  %s34_s26, 1024, %s36_s28, [#allocation6], %s854_s9, %s854_s9, %s855_s10  }
   0x7   :  { %s856_s11 = smov [#allocation2]   ;;  %s48_s1 = sshll.u32 %s941_s3, 4  ;;  %s49_s1 = int_to_ptr.hbm [resolvable:$true] %s48_s1 }
   0x8   :  { %s22_s12 = sshll.u32 %s856_s11, 4  ;;  %s857_s0 = smov [#allocation7]   ;;  %s23_s12 = int_to_ptr.vmem [resolvable:$true] %s22_s12 }
   0x9   :  { %28 = dma.hbm_to_vmem [thread:$0]  %s21_s8, 128, %s23_s12, [#allocation3], %s854_s9, %s854_s9, %s855_s10  }
   0xa   :  { %s50_s15 = sshll.u32 %s857_s0, 4  ;;  %s63_s18 = sshll.u32 %s943_s5, 4  ;;  %s51_s15 = int_to_ptr.vmem [resolvable:$true] %s50_s15  ;;  %s64_s18 = int_to_ptr.hbm [resolvable:$true] %s63_s18 }
   0xb   :  { %s858_s19 = smov 128   ;;  %s859_s20 = smov 8  }
   0xc   :  { %56 = dma.hbm_to_vmem [thread:$0]  %s49_s1, 2048, %s51_s15, [#allocation6], %s858_s19, %s858_s19, %s859_s20  }
   0xd   :  { %s860_s21 = smov [#allocation8]  }
   0xe   :  { %s65_s22 = sshll.u32 %s860_s21, 4  ;;  %s66_s22 = int_to_ptr.vmem [resolvable:$true] %s65_s22 }
   0xf   :  { %71 = dma.hbm_to_vmem [thread:$0]  %s64_s18, 2048, %s66_s22, [#allocation9], %s854_s9, %s854_s9, %s855_s10  }
  0x10   :  { %845 = dma.done.wait [#allocation3], 128  }
  0x11   :  { %846 = vsyncadd [#allocation3], 4294967168 }
  0x12   :  { %847 = dma.done.wait [#allocation6], 3072  }
  0x13   :  { %848 = vsyncadd [#allocation6], 4294964224 }
  0x14   :  { %849 = dma.done.wait [#allocation9], 2048  }
  0x15   :  { %850 = vsyncadd [#allocation9], 4294965248  ;;  %v676_v0 = vld [vmem:[#allocation5 + $0x38] sm:$0xff]  ;;  %v675_v1 = vld [vmem:[#allocation5 + $0x30] sm:$0xff]  ;;  %s861_s25 = smov [#allocation10]   ;;  %s489_s29 = sshll.u32 %s945_s7, 4  ;;  %s490_s29 = int_to_ptr.hbm [resolvable:$true] %s489_s29 }
  0x16   :  { %166 = vmatpush.bf16.msra.mxu0 %v676_v0  ;;  %v598_v2 = vld [vmem:[#allocation7 + $0x70] sm:$0xf]  ;;  %v692_v3 = vld [vmem:[#allocation7 + $0x74] sm:$0xf0]  ;;  %v691_v4 = vld [vmem:[#allocation7 + $0x74] sm:$0xf] }
  0x17   :  { %v599_v5 = vor.u32 %v692_v3, %v598_v2  ;;  %v600_v6 = vld [vmem:[#allocation7 + $0x78] sm:$0xf0]  ;;  %v590_v7 = vld [vmem:[#allocation7 + $0x60] sm:$0xf]  ;;  %v690_v8 = vld [vmem:[#allocation7 + $0x64] sm:$0xf0] }
  0x18   :  { %v603_v9 = vor.u32 %v691_v4, %v600_v6  ;;  %v689_v10 = vld [vmem:[#allocation7 + $0x64] sm:$0xf]  ;;  %v592_v11 = vld [vmem:[#allocation7 + $0x68] sm:$0xf0]  ;;  %v591_v13 = vor.u32 %v690_v8, %v590_v7  ;;  %v582_v15 = vld [vmem:[#allocation7 + $0x50] sm:$0xf] }
  0x19   :  { %v674_v12 = vld [vmem:[#allocation5 + $0x28] sm:$0xff]  ;;  %285 = vmatpush.bf16.msra.mxu1 %v599_v5  ;;  %v595_v14 = vor.u32 %v689_v10, %v592_v11  ;;  %v688_v16 = vld [vmem:[#allocation7 + $0x54] sm:$0xf0]  ;;  %v687_v17 = vld [vmem:[#allocation7 + $0x54] sm:$0xf]  ;;  %s487_s26 = sshll.u32 %s861_s25, 4  ;;  %s488_s26 = int_to_ptr.vmem [resolvable:$true] %s487_s26 }
  0x1a   :  { %167 = vmatpush.bf16.msra.mxu0 %v675_v1  ;;  %299 = vmatpush.bf16.msra.mxu2 %v603_v9  ;;  %v584_v18 = vld [vmem:[#allocation7 + $0x58] sm:$0xf0]  ;;  %v673_v19 = vld [vmem:[#allocation5 + $0x20] sm:$0xff]  ;;  %v583_v20 = vor.u32 %v688_v16, %v582_v15  ;;  %v686_v23 = vld [vmem:[#allocation7 + $0x44] sm:$0xf0] }
  0x1b   :  { %v587_v21 = vor.u32 %v687_v17, %v584_v18  ;;  %v574_v22 = vld [vmem:[#allocation7 + $0x40] sm:$0xf]  ;;  %v685_v24 = vld [vmem:[#allocation7 + $0x44] sm:$0xf]  ;;  %v576_v25 = vld [vmem:[#allocation7 + $0x48] sm:$0xf0] }
  0x1c   :  { %v672_v26 = vld [vmem:[#allocation5 + $0x18] sm:$0xff]  ;;  %v575_v27 = vor.u32 %v686_v23, %v574_v22  ;;  %v579_v28 = vor.u32 %v685_v24, %v576_v25  ;;  %v671_v29 = vld [vmem:[#allocation5 + $0x10] sm:$0xff]  ;;  %v670_v30 = vld [vmem:[#allocation5 + $0x8] sm:$0xff] }
  0x1d   :  { %286 = vmatpush.bf16.msra.mxu1 %v591_v13  ;;  %v669_v31 = vld [vmem:[#allocation5] sm:$0xff]  ;;  %v668_v32 = vld [vmem:[#allocation2] sm:$0xff]  ;;  %v566_v33 = vld [vmem:[#allocation7 + $0x30] sm:$0xf] }
  0x1e   :  { %168 = vmatpush.bf16.msra.mxu0 %v674_v12  ;;  %300 = vmatpush.bf16.msra.mxu2 %v595_v14  ;;  %v684_v34 = vld [vmem:[#allocation7 + $0x34] sm:$0xf0]  ;;  %v683_v35 = vld [vmem:[#allocation7 + $0x34] sm:$0xf]  ;;  %v568_v37 = vld [vmem:[#allocation7 + $0x38] sm:$0xf0] }
  0x1f   :  { %v567_v36 = vor.u32 %v684_v34, %v566_v33  ;;  %v571_v38 = vor.u32 %v683_v35, %v568_v37  ;;  %v558_v39 = vld [vmem:[#allocation7 + $0x20] sm:$0xf]  ;;  %v682_v40 = vld [vmem:[#allocation7 + $0x24] sm:$0xf0]  ;;  %v681_v41 = vld [vmem:[#allocation7 + $0x24] sm:$0xf] }
  0x20   :  { %v559_v42 = vor.u32 %v682_v40, %v558_v39  ;;  %v560_v43 = vld [vmem:[#allocation7 + $0x28] sm:$0xf0]  ;;  %v550_v45 = vld [vmem:[#allocation7 + $0x10] sm:$0xf]  ;;  %v680_v46 = vld [vmem:[#allocation7 + $0x14] sm:$0xf0] }
  0x21   :  { %287 = vmatpush.bf16.msra.mxu1 %v583_v20  ;;  %v563_v44 = vor.u32 %v681_v41, %v560_v43  ;;  %v679_v47 = vld [vmem:[#allocation7 + $0x14] sm:$0xf]  ;;  %v551_v48 = vor.u32 %v680_v46, %v550_v45  ;;  %v552_v49 = vld [vmem:[#allocation7 + $0x18] sm:$0xf0]  ;;  %v542_v51 = vld [vmem:[#allocation7] sm:$0xf] }
  0x22   :  { %169 = vmatpush.bf16.msra.mxu0 %v673_v19  ;;  %301 = vmatpush.bf16.msra.mxu2 %v587_v21  ;;  %v555_v50 = vor.u32 %v679_v47, %v552_v49  ;;  %v678_v52 = vld [vmem:[#allocation7 + $0x4] sm:$0xf0]  ;;  %v677_v53 = vld [vmem:[#allocation7 + $0x4] sm:$0xf]  ;;  %v544_v55 = vld [vmem:[#allocation7 + $0x8] sm:$0xf0] }
  0x23   :  { %v543_v54 = vor.u32 %v678_v52, %v542_v51  ;;  %v547_v56 = vor.u32 %v677_v53, %v544_v55  ;;  %v700_v57 = vld [vmem:[#allocation8 + $0x38] sm:$0xff]  ;;  %v699_v59 = vld [vmem:[#allocation8 + $0x30] sm:$0xff]  ;;  %v698_v61 = vld [vmem:[#allocation8 + $0x28] sm:$0xff] }
  0x24   :  { %v708_v58 = vld [vmem:[#allocation8 + $0x78] sm:$0xff]  ;;  %451 = vmatpush.bf16.msra.mxu3 %v700_v57  ;;  %v707_v60 = vld [vmem:[#allocation8 + $0x70] sm:$0xff]  ;;  %v706_v62 = vld [vmem:[#allocation8 + $0x68] sm:$0xff] }
  0x25   :  { %288 = vmatpush.bf16.msra.mxu1 %v575_v27  ;;  %v697_v63 = vld [vmem:[#allocation8 + $0x20] sm:$0xff]  ;;  %v723_v1 = vld [vmem:[%s940_s2] ss:$0 sm:$0xff]  ;;  %v695_v10 = vld [vmem:[#allocation8 + $0x10] sm:$0xff] }
  0x26   :  { %170 = vmatpush.bf16.msra.mxu0 %v672_v26  ;;  %302 = vmatpush.bf16.msra.mxu2 %v579_v28  ;;  %v696_v8 = vld [vmem:[#allocation8 + $0x18] sm:$0xff]  ;;  %v705_v9 = vld [vmem:[#allocation8 + $0x60] sm:$0xff]  ;;  %v694_v12 = vld [vmem:[#allocation8 + $0x8] sm:$0xff] }
  0x27   :  { %v704_v11 = vld [vmem:[#allocation8 + $0x58] sm:$0xff]  ;;  %v703_v13 = vld [vmem:[#allocation8 + $0x50] sm:$0xff]  ;;  %v693_v14 = vld [vmem:[#allocation8] sm:$0xff] }
  0x28   :  { %452 = vmatpush.bf16.msra.mxu3 %v699_v59  ;;  %v702_v15 = vld [vmem:[#allocation8 + $0x48] sm:$0xff]  ;;  %v701_v16 = vld [vmem:[#allocation8 + $0x40] sm:$0xff]  ;;  %v199_v17 = vld [vmem:[%s942_s4] sm:$0x3] }
  0x29   :  { %289 = vmatpush.bf16.msra.mxu1 %v567_v36  ;;  %v201_v19 = vperm.slane %v199_v17, 0  ;;  %v202_v23 = vperm.slane %v199_v17, 1  ;;  %v724_v36 = vld [vmem:[%s944_s6] ss:$0 sm:$0xff] }
  0x2a   :  { %171 = vmatpush.bf16.msra.mxu0 %v671_v29  ;;  %303 = vmatpush.bf16.msra.mxu2 %v571_v38 }
  0x2c   :  { %453 = vmatpush.bf16.msra.mxu3 %v698_v61 }
  0x2d   :  { %290 = vmatpush.bf16.msra.mxu1 %v559_v42 }
  0x2e   :  { %172 = vmatpush.bf16.msra.mxu0 %v670_v30  ;;  %304 = vmatpush.bf16.msra.mxu2 %v563_v44 }
  0x30   :  { %454 = vmatpush.bf16.msra.mxu3 %v697_v63 }
  0x31   :  { %291 = vmatpush.bf16.msra.mxu1 %v551_v48 }
  0x32   :  { %173 = vmatpush.bf16.msra.mxu0 %v669_v31  ;;  %305 = vmatpush.bf16.msra.mxu2 %v555_v50 }
  0x34   :  { %455 = vmatpush.bf16.msra.mxu3 %v696_v8 }
  0x35   :  { %174 = vmatmul.bf16.vlgmr.msra.gmra.mxu0 %v668_v32  ;;  %292 = vmatpush.bf16.msra.mxu1 %v543_v54 }
  0x36   :  { %306 = vmatpush.bf16.msra.mxu2 %v547_v56  ;;  %465 = vmatpush.bf16.msrb.mxu0 %v708_v58 }
  0x38   :  { %456 = vmatpush.bf16.msra.mxu3 %v695_v10 }
  0x3a   :  { %466 = vmatpush.bf16.msrb.mxu0 %v707_v60 }
  0x3c   :  { %457 = vmatpush.bf16.msra.mxu3 %v694_v12 }
  0x3e   :  { %467 = vmatpush.bf16.msrb.mxu0 %v706_v62 }
  0x40   :  { %458 = vmatpush.bf16.msra.mxu3 %v693_v14 }
  0x42   :  { %468 = vmatpush.bf16.msrb.mxu0 %v705_v9 }
  0x46   :  { %469 = vmatpush.bf16.msrb.mxu0 %v704_v11 }
  0x4a   :  { %470 = vmatpush.bf16.msrb.mxu0 %v703_v13 }
  0x4e   :  { %471 = vmatpush.bf16.msrb.mxu0 %v702_v15 }
  0x52   :  { %472 = vmatpush.bf16.msrb.mxu0 %v701_v16 }
  0xb2   :  { %v175_v0 = vpop.f32.mrf.mxu0 }
  0xb3   :  { %v176_v2 = vadd.f32 %v723_v1, %v175_v0 }
  0xb5   :  { %v180_v5 = vmax.f32 %v176_v2, 0.0 }
  0xba   :  { %v177_v3 = vpop.f32.mrf.mxu0 }
  0xbb   :  { %v178_v4 = vadd.f32 %v723_v1, %v177_v3 }
  0xbd   :  { %v181_v6 = vmax.f32 %v178_v4, 0.0 }
  0xbf   :  { %v182_v7 = vpack.c.bf16 %v181_v6, %v180_v5 }
  0xc1   :  { %293 = vmatmul.bf16.vlgmr.msra.gmra.mxu1 %v182_v7  ;;  %307 = vmatmul.bf16.vlgmr.msra.gmra.mxu2 %v182_v7 }
 0x13e   :  { %v294_v18 = vpop.f32.mrf.mxu1 }
 0x13f   :  { %v295_v21 = vadd.f32 %v294_v18, %v201_v19 }
 0x141   :  { %v313_v25 = vmax.f32 %v295_v21, 0.0 }
 0x144   :  { %v308_v20 = vpop.f32.mrf.mxu2 }
 0x145   :  { %v309_v27 = vadd.f32 %v308_v20, %v202_v23 }
 0x146   :  { %v296_v22 = vpop.f32.mrf.mxu1 }
 0x147   :  { %v297_v24 = vadd.f32 %v296_v22, %v201_v19  ;;  %v314_v31 = vmax.f32 %v309_v27, 0.0 }
 0x149   :  { %v315_v26 = vmax.f32 %v297_v24, 0.0 }
 0x14b   :  { %v317_v28 = vpack.c.bf16 %v315_v26, %v313_v25 }
 0x14c   :  { %v310_v29 = vpop.f32.mrf.mxu2 }
 0x14d   :  { %v311_v30 = vadd.f32 %v310_v29, %v202_v23  ;;  %459 = vmatmul.bf16.vlgmr.msra.gmra.mxu3 %v317_v28 }
 0x14f   :  { %v316_v32 = vmax.f32 %v311_v30, 0.0 }
 0x151   :  { %v318_v33 = vpack.c.bf16 %v316_v32, %v314_v31 }
 0x153   :  { %473 = vmatmul.bf16.vlgmr.msrb.gmra.mxu0 %v318_v33 }
 0x1d0   :  { %v460_v34 = vpop.f32.mrf.mxu3  ;;  %v474_v35 = vpop.f32.mrf.mxu0 }
 0x1d1   :  { %v461_v37 = vadd.f32 %v724_v36, %v460_v34 }
 0x1d3   :  { %v475_v41 = vadd.f32 %v474_v35, %v461_v37 }
 0x1d8   :  { %v462_v38 = vpop.f32.mrf.mxu3  ;;  %v476_v40 = vpop.f32.mrf.mxu0 }
 0x1d9   :  { %v463_v39 = vadd.f32 %v724_v36, %v462_v38 }
 0x1db   :  { %v477_v42 = vadd.f32 %v476_v40, %v463_v39 }
 0x1dd   :  { %v712_v43 = vpack.c.bf16 %v477_v42, %v475_v41 }
 0x1df   :  { %713 = vst [vmem:[#allocation10] sm:$0xff] %v712_v43  }
 0x1e0   :  { %495 = dma.vmem_to_hbm [thread:$0]  %s488_s26, 128, %s490_s29, [#allocation4], %s854_s9, %s854_s9, %s855_s10  }
 0x1e1   :  { %851 = dma.done.wait [#allocation4], 128  }
 0x1e2   :  { %852 = vsyncadd [#allocation4], 4294967168 }
 0x1e3   :  { %500 = vsyncpa [#allocation3], 1 }
 0x1e4   :  { %501 = vsyncpa [#allocation6], 1 }
 0x1e5   :  { %502 = vsyncpa [#allocation9], 1 }
 0x1e6   :  { %503 = vsyncpa [#allocation4], 1 }

</bundles_post_ra>
